<compile_context>
chip_gen: v7x
topology: tpu7x:2x2x1
jax: 0.10.0
libtpu: 0.0.40
codegen_flags: <defaults>
</compile_context>

<pallas_src>
import math
import functools

import jax
import jax.numpy as jnp
from jax.experimental import pallas as pl
from jax.experimental.pallas import tpu as pltpu


def _round_up(n, m):
    return ((n + m - 1) // m) * m


def _pick_vmem_limit_bytes():
    # v7x has only 64 MiB physical per-TC VMEM -> leave headroom; v5e/v6e have
    # 128 MiB and can go higher.  Fall back conservatively if the query fails
    # (e.g. interpret mode on CPU).
    try:
        cap = pltpu.get_tpu_info().vmem_capacity_bytes
    except Exception:
        return 48 * 1024 * 1024
    return max(32 * 1024 * 1024, min(100 * 1024 * 1024, int(cap * 0.8)))


def _aamsoftmax_kernel(x_ref, w_ref, lab_ref, stats_ref,
                       xn_ref, m_ref, l_ref, tgt_ref, pred_ref, *,
                       cos_m, sin_m, th, mm, scale, easy_margin,
                       num_classes, padded_classes, num_rows, padded_rows,
                       tb, c_chunk):
    k = pl.program_id(1)              # class-chunk index (innermost, arbitrary)
    n_k = pl.num_programs(1)

    # ---- per-batch-tile init on the first class chunk -----------------------
    @pl.when(k == 0)
    def _init():
        x = x_ref[...].astype(jnp.float32)                       # (tb, Dp)
        sumsq = jnp.sum(x * x, axis=-1, keepdims=True)
        # F.normalize(x, dim=1) with eps=1e-12  ==  x * rsqrt(max(sumsq, 1e-24))
        x_n = x * jax.lax.rsqrt(jnp.maximum(sumsq, 1e-24))
        xn_ref[...] = x_n.astype(jnp.bfloat16)
        m_ref[...] = jnp.full(m_ref.shape, -1e30, dtype=jnp.float32)
        l_ref[...] = jnp.zeros(l_ref.shape, dtype=jnp.float32)
        tgt_ref[...] = jnp.zeros(tgt_ref.shape, dtype=jnp.float32)
        pred_ref[...] = jnp.full(pred_ref.shape, 2 ** 30, dtype=jnp.int32)

    lab = lab_ref[...]                                            # (tb, 1) int32

    # scaled cosine chunk on the MXU: bf16 operands (scale folded into w),
    # f32 accumulation, contracting the last (lane) dim of both operands.
    cos_s = jax.lax.dot_general(
        xn_ref[...], w_ref[...],
        dimension_numbers=(((1,), (1,)), ((), ())),
        preferred_element_type=jnp.float32)                       # (tb, cc) f32

    base = k * c_chunk
    cls_idx = base + jax.lax.broadcasted_iota(jnp.int32, cos_s.shape, 1)
    one_hot = cls_idx == lab                                      # (tb, cc)

    # ---- target-column-only angular-margin math (tb, 1) ---------------------
    t_cos_s = jnp.sum(jnp.where(one_hot, cos_s, 0.0), axis=-1, keepdims=True)
    t_cos = t_cos_s * (1.0 / scale)
    sine = jnp.sqrt(jnp.clip(1.0 - t_cos * t_cos, 0.0, 1.0))
    phi = t_cos * cos_m - sine * sin_m
    if easy_margin:
        phi = jnp.where(t_cos > 0.0, phi, t_cos)
    else:
        phi = jnp.where(t_cos - th > 0.0, phi, t_cos - mm)
    phi_s = phi * scale                                           # (tb, 1)

    # scaled logits for this chunk (target column replaced by phi*s)
    out = jnp.where(one_hot, phi_s, cos_s)                        # (tb, cc)
    if num_classes < padded_classes:       # static: mask padded classes
        out = jnp.where(cls_idx < num_classes, out, -1e30)

    # ---- online logsumexp + running first-index argmax -----------------------
    chunk_max = jnp.max(out, axis=-1, keepdims=True)              # (tb, 1)
    m_old = m_ref[...]
    m_new = jnp.maximum(m_old, chunk_max)
    l_ref[...] = (l_ref[...] * jnp.exp(m_old - m_new)
                  + jnp.sum(jnp.exp(out - m_new), axis=-1, keepdims=True))
    m_ref[...] = m_new

    chunk_pred = jnp.min(jnp.where(out == chunk_max, cls_idx, 2 ** 30),
                         axis=-1, keepdims=True)                  # (tb, 1) int32
    # ties across chunks keep the earlier (smaller) index -> torch first-index rule
    pred_ref[...] = jnp.where(chunk_max > m_old, chunk_pred, pred_ref[...])

    # target logit accumulates only in the chunk that contains the label
    in_chunk = jnp.logical_and(lab >= base, lab < base + c_chunk)
    tgt_ref[...] = tgt_ref[...] + jnp.where(in_chunk, phi_s, 0.0)

    # ---- finalize on the last class chunk ------------------------------------
    @pl.when(k == n_k - 1)
    def _finalize():
        lse = m_ref[...] + jnp.log(l_ref[...])
        per_row_loss = lse - tgt_ref[...]                         # (tb, 1)
        per_row_corr = (pred_ref[...] == lab).astype(jnp.float32)
        if num_rows < padded_rows:         # static: zero padded batch rows
            row_idx = (pl.program_id(0) * tb
                       + jax.lax.broadcasted_iota(jnp.int32, (tb, 1), 0))
            valid = (row_idx < num_rows).astype(jnp.float32)
            per_row_loss = per_row_loss * valid
            per_row_corr = per_row_corr * valid
        # lane-dense stats slab: lane 0 = sum(loss), lane 1 = #correct
        lane = jax.lax.broadcasted_iota(jnp.int32, (tb, 128), 1)
        row_stats = (jnp.where(lane == 0, per_row_loss, 0.0)
                     + jnp.where(lane == 1, per_row_corr, 0.0))
        tile_stats = jnp.sum(row_stats, axis=0, keepdims=True)    # (1, 128)
        stats_ref[...] = jnp.broadcast_to(tile_stats.reshape(1, 1, 128),
                                          (1, 8, 128))


def aamsoftmax_forward(x, weight, label, *, margin=0.2, scale=30.0,
                       easy_margin=False, tb=None, c_chunk=None):
    """AAM-Softmax forward. Returns (loss, prec1) like the PyTorch module."""
    B, D = x.shape
    C, Dw = weight.shape
    assert D == Dw
    assert label.shape[0] == B
    scale = float(scale)

    D_pad = _round_up(D, 128)

    # class chunking (innermost grid axis); small C -> single chunk.
    if c_chunk is None:
        c_chunk = min(1024, _round_up(C, 128))
    c_chunk = _round_up(c_chunk, 128)
    C_pad = _round_up(C, c_chunk)
    num_c_chunks = C_pad // c_chunk

    # batch tile: aim for >= 2 grid steps so the parallel axis can shard
    # across both v7x TensorCores; smaller tb also halves live (tb, cc) temps.
    if tb is None:
        tb = min(128, _round_up(pl.cdiv(B, 2), 8))
    tb = _round_up(tb, 8)
    B_pad = _round_up(B, tb)
    num_tiles = B_pad // tb

    # --- hoisted out of the kernel: L2-normalize the weight ONCE, fold the
    # softmax scale in, pad, cast bf16 (half the VMEM of f32).
    w32 = weight.astype(jnp.float32)
    w_n = w32 * jax.lax.rsqrt(
        jnp.maximum(jnp.sum(w32 * w32, axis=-1, keepdims=True), 1e-24))
    w_s = jnp.pad((w_n * scale).astype(jnp.bfloat16),
                  ((0, C_pad - C), (0, D_pad - D)))

    x_p = jnp.pad(x.astype(jnp.float32), ((0, B_pad - B), (0, D_pad - D)))
    lab2d = jnp.pad(label.astype(jnp.int32), (0, B_pad - B)).reshape(B_pad, 1)

    kernel = functools.partial(
        _aamsoftmax_kernel,
        cos_m=math.cos(margin), sin_m=math.sin(margin),
        th=math.cos(math.pi - margin), mm=math.sin(math.pi - margin) * margin,
        scale=scale, easy_margin=bool(easy_margin),
        num_classes=C, padded_classes=C_pad,
        num_rows=B, padded_rows=B_pad, tb=tb, c_chunk=c_chunk)

    # weight spec: streams C chunks; if the whole (padded) weight is one chunk
    # it is grid-invariant -> single-buffer it to halve its VMEM footprint.
    w_idx = lambda i, k: (k, 0)
    w_spec = pl.BlockSpec((c_chunk, D_pad), w_idx)
    if num_c_chunks == 1 and hasattr(pl, "Buffered"):
        try:
            w_spec = pl.BlockSpec((c_chunk, D_pad), w_idx,
                                  pipeline_mode=pl.Buffered(1))
        except TypeError:
            pass

    stats = pl.pallas_call(
        kernel,
        out_shape=jax.ShapeDtypeStruct((num_tiles, 8, 128), jnp.float32),
        grid_spec=pltpu.PrefetchScalarGridSpec(
            num_scalar_prefetch=0,
            grid=(num_tiles, num_c_chunks),
            in_specs=[
                pl.BlockSpec((tb, D_pad), lambda i, k: (i, 0)),   # x batch tile
                w_spec,                                           # weight chunk
                pl.BlockSpec((tb, 1), lambda i, k: (i, 0)),       # labels tile
            ],
            out_specs=pl.BlockSpec((1, 8, 128), lambda i, k: (i, 0, 0)),
            scratch_shapes=[
                pltpu.VMEM((tb, D_pad), jnp.bfloat16),   # normalized x (bf16)
                pltpu.VMEM((tb, 1), jnp.float32),        # running row max m
                pltpu.VMEM((tb, 1), jnp.float32),        # running exp-sum l
                pltpu.VMEM((tb, 1), jnp.float32),        # target logit
                pltpu.VMEM((tb, 1), jnp.int32),          # running argmax
            ]),
        compiler_params=pltpu.CompilerParams(
            dimension_semantics=("parallel", "arbitrary"),
            vmem_limit_bytes=_pick_vmem_limit_bytes()),
    )(x_p, w_s, lab2d)

    # nn.CrossEntropyLoss default reduction='mean'; prec1 = 100 * correct / B.
    loss = jnp.sum(stats[:, 0, 0]) / B
    prec1 = 100.0 * jnp.sum(stats[:, 0, 1]) / B
    return loss, prec1


if __name__ == "__main__":
    # Small synthetic config consistent with the module's __init__:
    #   embedding_dim = 32, num_classes = 16, batch = 8
    B, D, C = 8, 32, 16
    key = jax.random.PRNGKey(0)
    kx, kw, kl = jax.random.split(key, 3)

    x = jax.random.normal(kx, (B, D), dtype=jnp.float32)

    # xavier_normal_(weight, gain=1): std = sqrt(2 / (fan_in + fan_out))
    std = math.sqrt(2.0 / (C + D))
    weight = jax.random.normal(kw, (C, D), dtype=jnp.float32) * std

    label = jax.random.randint(kl, (B,), 0, C, dtype=jnp.int32)

    loss, prec1 = aamsoftmax_forward(
        x, weight, label, margin=0.2, scale=30.0, easy_margin=False)
    jax.block_until_ready((loss, prec1))
    print("KERNEL_OK")
</pallas_src>

<mosaic_0001>
module attributes {stable_mosaic.version = 11 : i64} {
  func.func @_aamsoftmax_kernel(%arg0: i32, %arg1: i32, %arg2: memref<8x128xf32, #tpu.memory_space<vmem>>, %arg3: memref<128x128xbf16, #tpu.memory_space<vmem>>, %arg4: memref<8x1xi32, #tpu.memory_space<vmem>>, %arg5: memref<1x8x128xf32, #tpu.memory_space<vmem>>, %arg6: memref<8x128xbf16, #tpu.memory_space<vmem>>, %arg7: memref<8x1xf32, #tpu.memory_space<vmem>>, %arg8: memref<8x1xf32, #tpu.memory_space<vmem>>, %arg9: memref<8x1xf32, #tpu.memory_space<vmem>>, %arg10: memref<8x1xi32, #tpu.memory_space<vmem>>) attributes {dimension_semantics = [#tpu.dimension_semantics<parallel>, #tpu.dimension_semantics<arbitrary>], iteration_bounds = array<i64: 1, 1>, scalar_prefetch = 0 : i64, scratch_operands = 5 : i64, tpu.core_type = #tpu.core_type<tc>, window_params = [{transform_indices = @transform_0, window_bounds = array<i64: 8, 128>}, {pipeline_mode = #tpu.pipeline_mode<synchronous>, transform_indices = @transform_1, window_bounds = array<i64: 128, 128>}, {transform_indices = @transform_2, window_bounds = array<i64: 8, 1>}, {transform_indices = @transform_3, window_bounds = array<i64: 1, 8, 128>}]} {
    %c0_i32 = arith.constant 0 : i32
    %0 = arith.cmpi eq, %arg1, %c0_i32 : i32
    %1 = arith.extui %0 : i1 to i32
    %c0_i32_0 = arith.constant 0 : i32
    %2 = arith.cmpi ne, %1, %c0_i32_0 : i32
    scf.if %2 {
      %c0_42 = arith.constant 0 : index
      %c0_43 = arith.constant 0 : index
      %88 = vector.load %arg2[%c0_42, %c0_43] : memref<8x128xf32, #tpu.memory_space<vmem>>, vector<8x128xf32>
      %89 = arith.mulf %88, %88 : vector<8x128xf32>
      %cst_44 = arith.constant dense<0.000000e+00> : vector<8xf32>
      %90 = vector.multi_reduction <add>, %89, %cst_44 [1] : vector<8x128xf32> to vector<8xf32>
      %91 = vector.shape_cast %90 : vector<8xf32> to vector<8x1xf32>
      %cst_45 = arith.constant 1.000000e-24 : f32
      %92 = vector.broadcast %cst_45 : f32 to vector<8x1xf32>
      %93 = arith.maximumf %91, %92 : vector<8x1xf32>
      %94 = math.rsqrt %93 : vector<8x1xf32>
      %95 = vector.broadcast %94 : vector<8x1xf32> to vector<8x128xf32>
      %96 = arith.mulf %88, %95 : vector<8x128xf32>
      %97 = arith.truncf %96 : vector<8x128xf32> to vector<8x128xbf16>
      %c0_46 = arith.constant 0 : index
      %c0_47 = arith.constant 0 : index
      %98 = vector.load %arg6[%c0_46, %c0_47] : memref<8x128xbf16, #tpu.memory_space<vmem>>, vector<8x128xbf16>
      tpu.vector_store %arg6[%c0_46, %c0_47], %97 {strides = array<i32>} : memref<8x128xbf16, #tpu.memory_space<vmem>>, vector<8x128xbf16>,
      %cst_48 = arith.constant -1.000000e+30 : f32
      %99 = vector.broadcast %cst_48 : f32 to vector<8x1xf32>
      %c0_49 = arith.constant 0 : index
      %c0_50 = arith.constant 0 : index
      %100 = vector.load %arg7[%c0_49, %c0_50] : memref<8x1xf32, #tpu.memory_space<vmem>>, vector<8x1xf32>
      tpu.vector_store %arg7[%c0_49, %c0_50], %99 {strides = array<i32>} : memref<8x1xf32, #tpu.memory_space<vmem>>, vector<8x1xf32>,
      %cst_51 = arith.constant 0.000000e+00 : f32
      %101 = vector.broadcast %cst_51 : f32 to vector<8x1xf32>
      %c0_52 = arith.constant 0 : index
      %c0_53 = arith.constant 0 : index
      %102 = vector.load %arg8[%c0_52, %c0_53] : memref<8x1xf32, #tpu.memory_space<vmem>>, vector<8x1xf32>
      tpu.vector_store %arg8[%c0_52, %c0_53], %101 {strides = array<i32>} : memref<8x1xf32, #tpu.memory_space<vmem>>, vector<8x1xf32>,
      %cst_54 = arith.constant 0.000000e+00 : f32
      %103 = vector.broadcast %cst_54 : f32 to vector<8x1xf32>
      %c0_55 = arith.constant 0 : index
      %c0_56 = arith.constant 0 : index
      %104 = vector.load %arg9[%c0_55, %c0_56] : memref<8x1xf32, #tpu.memory_space<vmem>>, vector<8x1xf32>
      tpu.vector_store %arg9[%c0_55, %c0_56], %103 {strides = array<i32>} : memref<8x1xf32, #tpu.memory_space<vmem>>, vector<8x1xf32>,
      %c1073741824_i32_57 = arith.constant 1073741824 : i32
      %105 = vector.broadcast %c1073741824_i32_57 : i32 to vector<8x1xi32>
      %c0_58 = arith.constant 0 : index
      %c0_59 = arith.constant 0 : index
      %106 = vector.load %arg10[%c0_58, %c0_59] : memref<8x1xi32, #tpu.memory_space<vmem>>, vector<8x1xi32>
      tpu.vector_store %arg10[%c0_58, %c0_59], %105 {strides = array<i32>} : memref<8x1xi32, #tpu.memory_space<vmem>>, vector<8x1xi32>,
    } else {
    }
    %c0 = arith.constant 0 : index
    %c0_1 = arith.constant 0 : index
    %3 = vector.load %arg4[%c0, %c0_1] : memref<8x1xi32, #tpu.memory_space<vmem>>, vector<8x1xi32>
    %c0_2 = arith.constant 0 : index
    %c0_3 = arith.constant 0 : index
    %4 = vector.load %arg6[%c0_2, %c0_3] : memref<8x128xbf16, #tpu.memory_space<vmem>>, vector<8x128xbf16>
    %c0_4 = arith.constant 0 : index
    %c0_5 = arith.constant 0 : index
    %5 = vector.load %arg3[%c0_4, %c0_5] : memref<128x128xbf16, #tpu.memory_space<vmem>>, vector<128x128xbf16>
    %cst = arith.constant dense<0.000000e+00> : vector<8x128xf32>
    %6 = tpu.matmul %4, %5, %cst {dimension_numbers = #tpu.dot_dimension_numbers<[1], [1], [0], [0], [0, 0, 1, 0], [], []>} : vector<8x128xbf16>, vector<128x128xbf16>, vector<8x128xf32> -> vector<8x128xf32>
    %c128_i32 = arith.constant 128 : i32
    %7 = arith.muli %arg1, %c128_i32 : i32
    %8 = tpu.iota {dimensions = array<i32: 1>} : vector<8x128xi32>
    %9 = vector.broadcast %7 : i32 to vector<8x128xi32>
    %10 = arith.addi %9, %8 : vector<8x128xi32>
    %11 = vector.broadcast %3 : vector<8x1xi32> to vector<8x128xi32>
    %12 = arith.cmpi eq, %10, %11 : vector<8x128xi32>
    %cst_6 = arith.constant 0.000000e+00 : f32
    %13 = vector.broadcast %cst_6 : f32 to vector<8x128xf32>
    %14 = arith.select %12, %6, %13 : vector<8x128xi1>, vector<8x128xf32>
    %cst_7 = arith.constant dense<0.000000e+00> : vector<8xf32>
    %15 = vector.multi_reduction <add>, %14, %cst_7 [1] : vector<8x128xf32> to vector<8xf32>
    %16 = vector.shape_cast %15 : vector<8xf32> to vector<8x1xf32>
    %cst_8 = arith.constant 0.0333333351 : f32
    %17 = vector.broadcast %cst_8 : f32 to vector<8x1xf32>
    %18 = arith.mulf %16, %17 : vector<8x1xf32>
    %19 = arith.mulf %18, %18 : vector<8x1xf32>
    %cst_9 = arith.constant 1.000000e+00 : f32
    %20 = vector.broadcast %cst_9 : f32 to vector<8x1xf32>
    %21 = arith.subf %20, %19 : vector<8x1xf32>
    %cst_10 = arith.constant 0.000000e+00 : f32
    %cst_11 = arith.constant 1.000000e+00 : f32
    %22 = vector.broadcast %cst_10 : f32 to vector<8x1xf32>
    %23 = arith.maximumf %22, %21 : vector<8x1xf32>
    %24 = vector.broadcast %cst_11 : f32 to vector<8x1xf32>
    %25 = arith.minimumf %24, %23 : vector<8x1xf32>
    %26 = math.sqrt %25 : vector<8x1xf32>
    %cst_12 = arith.constant 0.980066597 : f32
    %27 = vector.broadcast %cst_12 : f32 to vector<8x1xf32>
    %28 = arith.mulf %18, %27 : vector<8x1xf32>
    %cst_13 = arith.constant 0.198669329 : f32
    %29 = vector.broadcast %cst_13 : f32 to vector<8x1xf32>
    %30 = arith.mulf %26, %29 : vector<8x1xf32>
    %31 = arith.subf %28, %30 : vector<8x1xf32>
    %cst_14 = arith.constant -0.980066597 : f32
    %32 = vector.broadcast %cst_14 : f32 to vector<8x1xf32>
    %33 = arith.subf %18, %32 : vector<8x1xf32>
    %cst_15 = arith.constant 0.000000e+00 : f32
    %34 = vector.broadcast %cst_15 : f32 to vector<8x1xf32>
    %35 = arith.cmpf ogt, %33, %34 : vector<8x1xf32>
    %cst_16 = arith.constant 0.0397338644 : f32
    %36 = vector.broadcast %cst_16 : f32 to vector<8x1xf32>
    %37 = arith.subf %18, %36 : vector<8x1xf32>
    %38 = arith.select %35, %31, %37 : vector<8x1xi1>, vector<8x1xf32>
    %cst_17 = arith.constant 3.000000e+01 : f32
    %39 = vector.broadcast %cst_17 : f32 to vector<8x1xf32>
    %40 = arith.mulf %38, %39 : vector<8x1xf32>
    %41 = vector.shape_cast %40 : vector<8x1xf32> to vector<8x1xf32>
    %42 = vector.broadcast %41 : vector<8x1xf32> to vector<8x128xf32>
    %43 = arith.select %12, %42, %6 : vector<8x128xi1>, vector<8x128xf32>
    %c16_i32 = arith.constant 16 : i32
    %44 = vector.broadcast %c16_i32 : i32 to vector<8x128xi32>
    %45 = arith.cmpi slt, %10, %44 : vector<8x128xi32>
    %cst_18 = arith.constant -1.000000e+30 : f32
    %46 = vector.broadcast %cst_18 : f32 to vector<8x128xf32>
    %47 = arith.select %45, %43, %46 : vector<8x128xi1>, vector<8x128xf32>
    %cst_19 = arith.constant dense<0xFF800000> : vector<8xf32>
    %48 = vector.multi_reduction <maximumf>, %47, %cst_19 [1] : vector<8x128xf32> to vector<8xf32>
    %49 = vector.shape_cast %48 : vector<8xf32> to vector<8x1xf32>
    %c0_20 = arith.constant 0 : index
    %c0_21 = arith.constant 0 : index
    %50 = vector.load %arg7[%c0_20, %c0_21] : memref<8x1xf32, #tpu.memory_space<vmem>>, vector<8x1xf32>
    %51 = arith.maximumf %50, %49 : vector<8x1xf32>
    %c0_22 = arith.constant 0 : index
    %c0_23 = arith.constant 0 : index
    %52 = vector.load %arg8[%c0_22, %c0_23] : memref<8x1xf32, #tpu.memory_space<vmem>>, vector<8x1xf32>
    %53 = arith.subf %50, %51 : vector<8x1xf32>
    %54 = math.exp %53 : vector<8x1xf32>
    %55 = arith.mulf %52, %54 : vector<8x1xf32>
    %56 = vector.broadcast %51 : vector<8x1xf32> to vector<8x128xf32>
    %57 = arith.subf %47, %56 : vector<8x128xf32>
    %58 = math.exp %57 : vector<8x128xf32>
    %cst_24 = arith.constant dense<0.000000e+00> : vector<8xf32>
    %59 = vector.multi_reduction <add>, %58, %cst_24 [1] : vector<8x128xf32> to vector<8xf32>
    %60 = vector.shape_cast %59 : vector<8xf32> to vector<8x1xf32>
    %61 = arith.addf %55, %60 : vector<8x1xf32>
    %c0_25 = arith.constant 0 : index
    %c0_26 = arith.constant 0 : index
    %62 = vector.load %arg8[%c0_25, %c0_26] : memref<8x1xf32, #tpu.memory_space<vmem>>, vector<8x1xf32>
    tpu.vector_store %arg8[%c0_25, %c0_26], %61 {strides = array<i32>} : memref<8x1xf32, #tpu.memory_space<vmem>>, vector<8x1xf32>,
    %c0_27 = arith.constant 0 : index
    %c0_28 = arith.constant 0 : index
    %63 = vector.load %arg7[%c0_27, %c0_28] : memref<8x1xf32, #tpu.memory_space<vmem>>, vector<8x1xf32>
    tpu.vector_store %arg7[%c0_27, %c0_28], %51 {strides = array<i32>} : memref<8x1xf32, #tpu.memory_space<vmem>>, vector<8x1xf32>,
    %64 = vector.broadcast %49 : vector<8x1xf32> to vector<8x128xf32>
    %65 = arith.cmpf oeq, %47, %64 : vector<8x128xf32>
    %c1073741824_i32 = arith.constant 1073741824 : i32
    %66 = vector.broadcast %c1073741824_i32 : i32 to vector<8x128xi32>
    %67 = arith.select %65, %10, %66 : vector<8x128xi1>, vector<8x128xi32>
    %cst_29 = arith.constant dense<2147483647> : vector<8xi32>
    %68 = vector.multi_reduction <minsi>, %67, %cst_29 [1] : vector<8x128xi32> to vector<8xi32>
    %69 = vector.shape_cast %68 : vector<8xi32> to vector<8x1xi32>
    %70 = arith.cmpf ogt, %49, %50 : vector<8x1xf32>
    %c0_30 = arith.constant 0 : index
    %c0_31 = arith.constant 0 : index
    %71 = vector.load %arg10[%c0_30, %c0_31] : memref<8x1xi32, #tpu.memory_space<vmem>>, vector<8x1xi32>
    %72 = arith.select %70, %69, %71 : vector<8x1xi1>, vector<8x1xi32>
    %c0_32 = arith.constant 0 : index
    %c0_33 = arith.constant 0 : index
    %73 = vector.load %arg10[%c0_32, %c0_33] : memref<8x1xi32, #tpu.memory_space<vmem>>, vector<8x1xi32>
    tpu.vector_store %arg10[%c0_32, %c0_33], %72 {strides = array<i32>} : memref<8x1xi32, #tpu.memory_space<vmem>>, vector<8x1xi32>,
    %74 = vector.broadcast %7 : i32 to vector<8x1xi32>
    %75 = arith.cmpi sge, %3, %74 : vector<8x1xi32>
    %c128_i32_34 = arith.constant 128 : i32
    %76 = arith.addi %7, %c128_i32_34 : i32
    %77 = vector.broadcast %76 : i32 to vector<8x1xi32>
    %78 = arith.cmpi slt, %3, %77 : vector<8x1xi32>
    %79 = arith.andi %75, %78 : vector<8x1xi1>
    %c0_35 = arith.constant 0 : index
    %c0_36 = arith.constant 0 : index
    %80 = vector.load %arg9[%c0_35, %c0_36] : memref<8x1xf32, #tpu.memory_space<vmem>>, vector<8x1xf32>
    %cst_37 = arith.constant 0.000000e+00 : f32
    %81 = vector.broadcast %cst_37 : f32 to vector<8x1xf32>
    %82 = arith.select %79, %40, %81 : vector<8x1xi1>, vector<8x1xf32>
    %83 = arith.addf %80, %82 : vector<8x1xf32>
    %c0_38 = arith.constant 0 : index
    %c0_39 = arith.constant 0 : index
    %84 = vector.load %arg9[%c0_38, %c0_39] : memref<8x1xf32, #tpu.memory_space<vmem>>, vector<8x1xf32>
    tpu.vector_store %arg9[%c0_38, %c0_39], %83 {strides = array<i32>} : memref<8x1xf32, #tpu.memory_space<vmem>>, vector<8x1xf32>,
    %c0_i32_40 = arith.constant 0 : i32
    %85 = arith.cmpi eq, %arg1, %c0_i32_40 : i32
    %86 = arith.extui %85 : i1 to i32
    %c0_i32_41 = arith.constant 0 : i32
    %87 = arith.cmpi ne, %86, %c0_i32_41 : i32
    scf.if %87 {
      %c0_42 = arith.constant 0 : index
      %c0_43 = arith.constant 0 : index
      %88 = vector.load %arg7[%c0_42, %c0_43] : memref<8x1xf32, #tpu.memory_space<vmem>>, vector<8x1xf32>
      %c0_44 = arith.constant 0 : index
      %c0_45 = arith.constant 0 : index
      %89 = vector.load %arg8[%c0_44, %c0_45] : memref<8x1xf32, #tpu.memory_space<vmem>>, vector<8x1xf32>
      %90 = math.log %89 : vector<8x1xf32>
      %91 = arith.addf %88, %90 : vector<8x1xf32>
      %c0_46 = arith.constant 0 : index
      %c0_47 = arith.constant 0 : index
      %92 = vector.load %arg9[%c0_46, %c0_47] : memref<8x1xf32, #tpu.memory_space<vmem>>, vector<8x1xf32>
      %93 = arith.subf %91, %92 : vector<8x1xf32>
      %c0_48 = arith.constant 0 : index
      %c0_49 = arith.constant 0 : index
      %94 = vector.load %arg10[%c0_48, %c0_49] : memref<8x1xi32, #tpu.memory_space<vmem>>, vector<8x1xi32>
      %95 = arith.cmpi eq, %94, %3 : vector<8x1xi32>
      %96 = arith.extui %95 : vector<8x1xi1> to vector<8x1xi32>
      %97 = arith.sitofp %96 : vector<8x1xi32> to vector<8x1xf32>
      %98 = tpu.iota {dimensions = array<i32: 1>} : vector<8x128xi32>
      %c0_i32_50 = arith.constant 0 : i32
      %99 = vector.broadcast %c0_i32_50 : i32 to vector<8x128xi32>
      %100 = arith.cmpi eq, %98, %99 : vector<8x128xi32>
      %cst_51 = arith.constant 0.000000e+00 : f32
      %101 = vector.shape_cast %93 : vector<8x1xf32> to vector<8x1xf32>
      %102 = vector.broadcast %101 : vector<8x1xf32> to vector<8x128xf32>
      %103 = vector.broadcast %cst_51 : f32 to vector<8x128xf32>
      %104 = arith.select %100, %102, %103 : vector<8x128xi1>, vector<8x128xf32>
      %c1_i32 = arith.constant 1 : i32
      %105 = vector.broadcast %c1_i32 : i32 to vector<8x128xi32>
      %106 = arith.cmpi eq, %98, %105 : vector<8x128xi32>
      %cst_52 = arith.constant 0.000000e+00 : f32
      %107 = vector.shape_cast %97 : vector<8x1xf32> to vector<8x1xf32>
      %108 = vector.broadcast %107 : vector<8x1xf32> to vector<8x128xf32>
      %109 = vector.broadcast %cst_52 : f32 to vector<8x128xf32>
      %110 = arith.select %106, %108, %109 : vector<8x128xi1>, vector<8x128xf32>
      %111 = arith.addf %104, %110 : vector<8x128xf32>
      %cst_53 = arith.constant dense<0.000000e+00> : vector<128xf32>
      %112 = vector.multi_reduction <add>, %111, %cst_53 [0] : vector<8x128xf32> to vector<128xf32>
      %113 = vector.shape_cast %112 : vector<128xf32> to vector<1x128xf32>
      %114 = vector.shape_cast %113 : vector<1x128xf32> to vector<1x1x128xf32>
      %115 = vector.shape_cast %114 : vector<1x1x128xf32> to vector<1x1x128xf32>
      %116 = vector.broadcast %115 : vector<1x1x128xf32> to vector<1x8x128xf32>
      %c0_54 = arith.constant 0 : index
      %c0_55 = arith.constant 0 : index
      %c0_56 = arith.constant 0 : index
      %117 = vector.load %arg5[%c0_54, %c0_55, %c0_56] : memref<1x8x128xf32, #tpu.memory_space<vmem>>, vector<1x8x128xf32>
      tpu.vector_store %arg5[%c0_54, %c0_55, %c0_56], %116 {strides = array<i32>} : memref<1x8x128xf32, #tpu.memory_space<vmem>>, vector<1x8x128xf32>,
    } else {
    }
    return
  }
  func.func @transform_0(%arg0: i32, %arg1: i32) -> (i32, i32) {
    %c0_i32 = arith.constant 0 : i32
    %c0_i32_0 = arith.constant 0 : i32
    return %arg0, %c0_i32 : i32, i32
  }
  func.func @transform_1(%arg0: i32, %arg1: i32) -> (i32, i32) {
    %c0_i32 = arith.constant 0 : i32
    %c0_i32_0 = arith.constant 0 : i32
    return %arg1, %c0_i32 : i32, i32
  }
  func.func @transform_2(%arg0: i32, %arg1: i32) -> (i32, i32) {
    %c0_i32 = arith.constant 0 : i32
    %c0_i32_0 = arith.constant 0 : i32
    return %arg0, %c0_i32 : i32, i32
  }
  func.func @transform_3(%arg0: i32, %arg1: i32) -> (i32, i32, i32) {
    %c0_i32 = arith.constant 0 : i32
    %c0_i32_0 = arith.constant 0 : i32
    %c0_i32_1 = arith.constant 0 : i32
    return %arg0, %c0_i32, %c0_i32_0 : i32, i32, i32
  }
}

</mosaic_0001>

<bundles_post_ra>
// kernel: tpu_custom_call.1
= control target key start
LH: loop header
LB: loop body
LE: loop exit
PB: predicated region body
PF: predicated region fallthrough
CT: control target
= control target key end

     0   :  { %8 = vsyncpa [#allocation8], 0  ;;  %s505_s0 = inlined_call_operand.vmem [shape: f32[8,128], index: 0, kind: input, shape index: {}]   ;;  %s506_s1 = inlined_call_operand.hbm [shape: bf16[128,128], index: 1, kind: input, shape index: {}]   ;;  %s507_s2 = inlined_call_operand.vmem [shape: s32[8,1], index: 2, kind: input, shape index: {}]   ;;  %s508_s3 = inlined_call_operand.hbm [shape: f32[1,8,128], index: 3, kind: output, shape index: {}]  }
   0x1   :  { %9 = vsyncpa [#allocation9], 0  ;;  %s409_s12 = smov [#allocation7]   ;;  %s361_s16 = scalar_lea.hbm %s506_s1, 1024 }
   0x2   :  { %s17_s13 = sshll.u32 %s409_s12, 4  ;;  %p362_p0 = scmp.ne.s32.totalorder %s506_s1, %s361_s16  ;;  %s18_s13 = int_to_ptr.vmem [resolvable:$true] %s17_s13 }
   0x3   :  { %p365_p1 = scmp.lt.u32.totalorder %s361_s16, %s506_s1 }
   0x5   :  { %p367_p2 = pnand %p365_p1, %p362_p0 }
   0x7   :  { %370 = shalt.err (!%p367_p2)
}
   0x8   :  { %s371_s21 = scalar_lea.vmem %s18_s13, 1024  ;;  %p376_p4 = scmp.lt.s32.totalorder %s18_s13, %s18_s13 }
   0x9   :  { %p372_p3 = scmp.ne.s32.totalorder %s18_s13, %s371_s21  ;;  %p377_p5 = scmp.lt.s32.totalorder %s371_s21, %s371_s21 }
   0xb   :  { %p378_p6 = por %p377_p5, %p376_p4 }
   0xd   :  { %p379_p7 = pnand %p378_p6, %p372_p3 }
   0xf   :  { %382 = shalt.err (!%p379_p7)
}
  0x10   :  { %s410_s22 = smov 64   ;;  %s411_s23 = smov 4  }
  0x11   :  { %23 = dma.hbm_to_vmem [thread:$0]  %s506_s1, 1024, %s18_s13, [#allocation8], %s410_s22, %s410_s22, %s411_s23  }
  0x12   :  { %405 = dma.done.wait [#allocation8], 1024  }
  0x13   :  { %406 = vsyncadd [#allocation8], 4294966272  ;;  %v412_v0 = vmov 0.0   ;;  %v34_v1 = vld [vmem:[%s505_s0] sm:$0xff]  ;;  %v344_v4 = vld [vmem:[#allocation7 + $0x8] sm:$0xff]   ;;  %vm413_vm0 = vmmov 0   ;;  %v155_v19 = vlaneseq }
  0x14   :  { %312 = vmatprep.subr.bf16.mxu0 %v412_v0  ;;  %v35_v2 = vmul.f32 %v34_v1, %v34_v1  ;;  %v343_v3 = vld [vmem:[#allocation7] sm:$0xff]   ;;  %v345_v5 = vld [vmem:[#allocation7 + $0x10] sm:$0xff]   ;;  %v346_v6 = vld [vmem:[#allocation7 + $0x18] sm:$0xff]   ;;  %328 = vmatprep.mubr.msk.bf16.mxu0 %vm413_vm0, %v412_v0  ;;  %v414_v10 = vmov 0   ;;  %vm43_vm2 = vcmask 7168  }
  0x15   :  { %313 = vmatpush3.bf16.xpose.msra.mxu0 %v343_v3  ;;  %v347_v7 = vld [vmem:[#allocation7 + $0x20] sm:$0xff]   ;;  %v348_v8 = vld [vmem:[#allocation7 + $0x28] sm:$0xff]   ;;  %341 = vset.pattern.permute.xlu0 %v414_v10  ;;  %v349_v11 = vld [vmem:[#allocation7 + $0x30] sm:$0xff]   ;;  %v468_v20 = vand.u32 127, %v155_v19  ;;  %46 = vst.msk [vmem:[#allocation5] sm:$0xff] %vm43_vm2, %v412_v0  ;;  %v416_v3 = vmov 1073741824  }
  0x16   :  { %36 = vadd.xlane.f32.xlu0 %v35_v2  ;;  %314 = vmatprep.subr.bf16.mxu0 %v412_v0  ;;  %v463_v9 = vld [vmem:[%s507_s2] sm:$0xff]  ;;  %45 = vst.msk [vmem:[#allocation4] sm:$0xff] %vm43_vm2, %v412_v0  ;;  %v415_v27 = vmov -1e+30   ;;  %47 = vst.msk [vmem:[#allocation6] sm:$0xff] %vm43_vm2, %v416_v3  ;;  %s417_s2 = smov [#allocation10]  }
  0x17   :  { %342 = vset.pattern.permute.xlu1 %v414_v10  ;;  %v350_v12 = vld [vmem:[#allocation7 + $0x38] sm:$0xff]   ;;  %44 = vst.msk [vmem:[#allocation3] sm:$0xff] %vm43_vm2, %v415_v27  ;;  %vm232_vm5 = vcmp.ge.s32.totalorder %v463_v9, 0  ;;  %vm235_vm6 = vcmp.lt.s32.totalorder %v463_v9, 128  ;;  %vm187_vm9 = vcmp.lt.s32.totalorder %v468_v20, 16  ;;  %vm255_vm14 = vcmp.eq.s32.totalorder %v468_v20, 0 }
  0x18   :  { %vm236_vm8 = vmand %vm232_vm5, %vm235_vm6  ;;  %vm262_vm15 = vcmp.eq.s32.totalorder %v468_v20, 1  ;;  %s283_s28 = sshll.u32 %s417_s2, 4  ;;  %s284_s28 = int_to_ptr.vmem [resolvable:$true] %s283_s28 }
  0x19   :  { %s383_s29 = scalar_lea.vmem %s284_s28, 128  ;;  %p388_p9 = scmp.lt.s32.totalorder %s284_s28, %s284_s28 }
  0x1a   :  { %p384_p8 = scmp.ne.s32.totalorder %s284_s28, %s383_s29  ;;  %p389_p10 = scmp.lt.s32.totalorder %s383_s29, %s383_s29 }
  0x1c   :  { %v237_v46 = vld [vmem:[#allocation5] sm:$0xff]  ;;  %p390_p11 = por %p389_p10, %p388_p9 }
  0x1d   :  { %315 = vmatpush3.bf16.xpose.msra.mxu0 %v344_v4 }
  0x1e   :  { %316 = vmatprep.subr.bf16.mxu0 %v412_v0  ;;  %v191_v51 = vld [vmem:[#allocation3] sm:$0xff]  ;;  %p391_p12 = pnand %p390_p11, %p384_p8 }
  0x25   :  { %317 = vmatpush3.bf16.xpose.msra.mxu0 %v345_v5 }
  0x26   :  { %318 = vmatprep.subr.bf16.mxu0 %v412_v0 }
  0x2c   :  { %160 = vperm.xlu0 %341, %v463_v9  }
  0x2d   :  { %319 = vmatpush3.bf16.xpose.msra.mxu0 %v346_v6  ;;  %v193_v6 = vld [vmem:[#allocation4] sm:$0xff] }
  0x2e   :  { %320 = vmatprep.subr.bf16.mxu0 %v412_v0 }
  0x35   :  { %321 = vmatpush3.bf16.xpose.msra.mxu0 %v347_v7 }
  0x36   :  { %322 = vmatprep.subr.bf16.mxu0 %v412_v0 }
  0x3d   :  { %323 = vmatpush3.bf16.xpose.msra.mxu0 %v348_v8 }
  0x3e   :  { %324 = vmatprep.subr.bf16.mxu0 %v412_v0 }
  0x45   :  { %325 = vmatpush3.bf16.xpose.msra.mxu0 %v349_v11 }
  0x46   :  { %326 = vmatprep.subr.bf16.mxu0 %v412_v0 }
  0x4d   :  { %327 = vmatpush3.bf16.xpose.msra.mxu0 %v350_v12 }
  0xa3   :  { %v37_v13 = vpop.xlane.xlu0 %36 }
  0xa4   :  { %v38_v14 = vmax.f32 %v37_v13, 1e-24 }
  0xa6   :  { %351 = vrsqrt.f32 %v38_v14 }
  0xab   :  { %v161_v21 = vpop.permute.xlu0 %160 }
  0xac   :  { %vm162_vm1 = vcmp.eq.s32.totalorder %v468_v20, %v161_v21 }
  0xb0   :  { %v352_v15 = vpop.eup %351 }
  0xb1   :  { %v40_v16 = vmul.f32 %v352_v15, %v34_v1 }
  0xb3   :  { %v41_v17 = vpack.c.bf16 %v40_v16, %v40_v16 }
  0xb5   :  { %42 = vst [vmem:[#allocation2] sm:$0xf] %v41_v17 }
  0xbc   :  { %v49_v18 = vld [vmem:[#allocation2] sm:$0xf] }
  0xbd   :  { %329 = vmatmul.mubr.bf16.vlgmr.msra.gmra.mrb[0].mxu0 %v49_v18 }
 0x190   :  { %v148_v22 = vpop.f32.mrb[0].mxu0 }
 0x191   :  { %v330_v23 = vpop.f32.mrb[1].mxu0  ;;  %v163_v24 = vsel %vm162_vm1, %v148_v22, 0.0 }
 0x192   :  { %v151_v25 = vpop.f32.mrb[2].mxu0  ;;  %164 = vadd.xlane.f32.xlu1 %v163_v24  ;;  %v229_v23 = vld [vmem:[#allocation6] sm:$0xff] }
 0x193   :  { %v331_v26 = vpop.f32.mrb[3].mxu0 }
 0x21f   :  { %v165_v28 = vpop.xlane.xlu1 %164 }
 0x220   :  { %v166_v29 = vmul.f32 0.033333335, %v165_v28 }
 0x222   :  { %v167_v30 = vmul.f32 %v166_v29, %v166_v29  ;;  %v300_v39 = vadd.f32 0.9800666, %v166_v29  ;;  %v178_v40 = vmul.f32 0.9800666, %v166_v29  ;;  %v301_v43 = vadd.f32 -0.039733864, %v166_v29 }
 0x224   :  { %v168_v31 = vsub.f32 1.0, %v167_v30  ;;  %vm182_vm7 = vcmp.gt.f32.partialorder %v300_v39, 0.0 }
 0x226   :  { %v169_v32 = vmax.f32 %v168_v31, 0.0 }
 0x228   :  { %v170_v33 = vmin.f32 %v169_v32, 1.0 }
 0x22a   :  { %353 = vrsqrt.f32 %v170_v33  ;;  %vm173_vm3 = vcmp.eq.f32.partialorder %v170_v33, inf  ;;  %v176_v36 = vand.u32 2147483648, %v170_v33  ;;  %vm175_vm4 = vcmp.eq.f32.partialorder %v170_v33, 0.0 }
 0x234   :  { %v354_v34 = vpop.eup %353 }
 0x235   :  { %v172_v35 = vmul.f32 %v354_v34, %v170_v33 }
 0x237   :  { %v174_v37 = vsel %vm173_vm3, %v170_v33, %v172_v35 }
 0x238   :  { %v177_v38 = vsel %vm175_vm4, %v176_v36, %v174_v37 }
 0x239   :  { %v179_v41 = vmul.f32 0.19866933, %v177_v38 }
 0x23b   :  { %v180_v42 = vsub.f32 %v178_v40, %v179_v41 }
 0x23d   :  { %v184_v44 = vsel %vm182_vm7, %v180_v42, %v301_v43 }
 0x23e   :  { %v185_v45 = vmul.f32 30.0, %v184_v44 }
 0x240   :  { %v186_v47 = vsel %vm162_vm1, %v185_v45, %v148_v22  ;;  %v238_v48 = vsel %vm236_vm8, %v185_v45, 0.0 }
 0x241   :  { %v188_v49 = vsel %vm187_vm9, %v186_v47, -1e+30  ;;  %v239_v50 = vadd.f32 %v238_v48, %v237_v46 }
 0x242   :  { %189 = vmax.xlane.f32.xlu1 %v188_v49 }
 0x243   :  { %240 = vst.msk [vmem:[#allocation5] sm:$0xff] %vm43_vm2, %v239_v50 }
 0x24a   :  { %v249_v16 = vld [vmem:[#allocation5] sm:$0xff] }
 0x2cf   :  { %v190_v52 = vpop.xlane.xlu1 %189 }
 0x2d0   :  { %v192_v53 = vmax.f32 %v191_v51, %v190_v52  ;;  %vm212_vm10 = vcmp.eq.f32.partialorder %v188_v49, %v190_v52  ;;  %vm228_vm12 = vcmp.gt.f32.partialorder %v190_v52, %v191_v51 }
 0x2d1   :  { %v213_v55 = vsel %vm212_vm10, %v468_v20, 1073741824 }
 0x2d2   :  { %v194_v54 = vsub.f32 %v191_v51, %v192_v53  ;;  %211 = vst.msk [vmem:[#allocation3] sm:$0xff] %vm43_vm2, %v192_v53  ;;  %200 = vperm.xlu1 %342, %v192_v53   ;;  %v215_v56 = vshra.s32 %v213_v55, 16  ;;  %v214_v62 = vand.u32 65535, %v213_v55 }
 0x2d4   :  { %v217_v57 = vcvt.s32.f32 %v215_v56  ;;  %v216_v1 = vcvt.s32.f32 %v214_v62  ;;  %v195_v4 = vmul.f32 1.442695, %v194_v54 }
 0x2d9   :  { %v244_v14 = vld [vmem:[#allocation3] sm:$0xff] }
 0x2f6   :  { %218 = vmin.xlane.f32.xlu1 %v217_v57 }
 0x351   :  { %v201_v58 = vpop.permute.xlu1 %200 }
 0x352   :  { %v203_v59 = vsub.f32 %v188_v49, %v201_v58 }
 0x354   :  { %v204_v60 = vmul.f32 1.442695, %v203_v59 }
 0x356   :  { %355 = vpow2.f32 %v204_v60 }
 0x357   :  { %357 = vpow2.f32 %v195_v4 }
 0x360   :  { %v356_v61 = vpop.eup %355 }
 0x361   :  { %206 = vadd.xlane.f32.xlu0 %v356_v61  ;;  %v358_v5 = vpop.eup %357 }
 0x362   :  { %v197_v7 = vmul.f32 %v358_v5, %v193_v6 }
 0x383   :  { %v219_v63 = vpop.xlane.xlu1 %218 }
 0x384   :  { %vm220_vm11 = vcmp.eq.f32.partialorder %v217_v57, %v219_v63  ;;  %v225_v18 = vcvt.f32.s32 %v219_v63 }
 0x385   :  { %v221_v2 = vsel %vm220_vm11, %v216_v1, inf }
 0x386   :  { %222 = vmin.xlane.f32.xlu1 %v221_v2  ;;  %v226_v21 = vshll.u32 %v225_v18, 16 }
 0x3ee   :  { %v207_v8 = vpop.xlane.xlu0 %206 }
 0x3ef   :  { %v208_v10 = vadd.f32 %v207_v8, %v197_v7 }
 0x3f1   :  { %210 = vst.msk [vmem:[#allocation4] sm:$0xff] %vm43_vm2, %v208_v10 }
 0x3f8   :  { %v245_v11 = vld [vmem:[#allocation4] sm:$0xff] }
 0x3f9   :  { %359 = vlog2.f32 %v245_v11 }
 0x403   :  { %v360_v12 = vpop.eup %359 }
 0x404   :  { %v247_v13 = vmul.f32 0.6931472, %v360_v12 }
 0x406   :  { %v248_v15 = vadd.f32 %v247_v13, %v244_v14 }
 0x408   :  { %v250_v17 = vsub.f32 %v248_v15, %v249_v16 }
 0x40a   :  { %258 = vperm.xlu1 %342, %v250_v17  }
 0x413   :  { %v223_v19 = vpop.xlane.xlu1 %222 }
 0x414   :  { %v224_v22 = vcvt.f32.s32 %v223_v19 }
 0x416   :  { %v227_v24 = vadd.s32 %v226_v21, %v224_v22 }
 0x418   :  { %v230_v25 = vsel %vm228_vm12, %v227_v24, %v229_v23 }
 0x419   :  { %231 = vst.msk [vmem:[#allocation6] sm:$0xff] %vm43_vm2, %v230_v25 }
 0x420   :  { %v251_v26 = vld [vmem:[#allocation6] sm:$0xff] }
 0x421   :  { %vm252_vm13 = vcmp.eq.s32.totalorder %v251_v26, %v463_v9 }
 0x422   :  { %v302_v27 = vsel %vm252_vm13, 1.0, %v412_v0 }
 0x423   :  { %265 = vperm.xlu0 %341, %v302_v27  }
 0x489   :  { %v259_v28 = vpop.permute.xlu1 %258 }
 0x48a   :  { %v261_v30 = vsel %vm255_vm14, %v259_v28, 0.0 }
 0x4a2   :  { %v266_v29 = vpop.permute.xlu0 %265 }
 0x4a3   :  { %v268_v31 = vsel %vm262_vm15, %v266_v29, 0.0 }
 0x4a4   :  { %v269_v32 = vadd.f32 %v268_v31, %v261_v30 }
 0x4a6   :  { %v270_v33 = vrot.slane %v269_v32, 4 }
 0x4a8   :  { %v271_v34 = vadd.f32 %v270_v33, %v269_v32 }
 0x4aa   :  { %v272_v35 = vrot.slane %v271_v34, 2 }
 0x4ac   :  { %v273_v36 = vadd.f32 %v272_v35, %v271_v34 }
 0x4ae   :  { %v274_v37 = vrot.slane %v273_v36, 1 }
 0x4b0   :  { %v275_v9 = vadd.f32 %v274_v37, %v273_v36 }
 0x4b2   :  { %276 = vst [vmem:[#allocation10] sm:$0xff] %v275_v9 }
 0x4b3   :  { %394 = shalt.err (!%p391_p12)
}
 0x4b4   :  { %s395_s5 = scalar_lea.hbm %s508_s3, 128 }
 0x4b5   :  { %p396_p13 = scmp.ne.s32.totalorder %s508_s3, %s395_s5  ;;  %p399_p0 = scmp.lt.u32.totalorder %s395_s5, %s508_s3 }
 0x4b7   :  { %p401_p1 = pnand %p399_p0, %p396_p13 }
 0x4b9   :  { %404 = shalt.err (!%p401_p1)
}
 0x4ba   :  { %286 = dma.vmem_to_hbm [thread:$0]  %s284_s28, 128, %s508_s3, [#allocation9]  }
 0x4bb   :  { %407 = dma.done.wait [#allocation9], 128  }
 0x4bc   :  { %408 = vsyncadd [#allocation9], 4294967168 }
 0x4bd   :  { %290 = vsyncpa [#allocation8], 1 }
 0x4be   :  { %291 = vsyncpa [#allocation9], 1 }

</bundles_post_ra>
